<compile_context>
chip_gen: v5e
topology: v5e:2x2
jax: 0.10.0
libtpu: 0.0.40
codegen_flags: <defaults>
</compile_context>

<pallas_src>
import jax
import jax.numpy as jnp
import numpy as np
from jax import lax
from jax.experimental import pallas as pl
from jax.experimental.pallas import tpu as pltpu

_STATIC_CIN_MAX = 8     # static unroll of the Cin loop up to this size
_CIN_CHUNK = 8          # sublane-aligned chunk size for the fori_loop path
_ACC_VREG_ELEMS = 16 * 8 * 128   # ~16 vregs (64 KiB) per f32 accumulator


def _round_up(x, m):
    return (x + m - 1) // m * m


def _pick_batch_block(b):
    """Batch block TB: largest divisor of b that is <= 8; for awkward large
    batches prefer TB=8 with padding over tiny blocks."""
    tb = min(8, b)
    while b % tb:
        tb -= 1
    if tb <= 2 and b > 8:
        tb = 8          # wrapper pads B up to a multiple of 8 instead
    return tb


def _pick_cout_block(cout, tb, mp):
    """Cout block TC: keep each (TB, TC, Mp) f32 accumulator within ~16 vregs.
    TC must be a multiple of 8 or the full Cout (8,128 tiling rule)."""
    budget = max(1, _ACC_VREG_ELEMS // (tb * mp))
    if cout <= budget:
        return cout
    tc = (budget // 8) * 8
    while tc >= 8:
        if cout % tc == 0:
            return tc
        tc -= 8
    return cout   # no tidy tile found; take the full dim (correct, may spill)


def _vmem_limit_bytes(tb, tc, cin, mp):
    """Scoped-VMEM limit from the actual double-buffered block footprint."""
    per_buf = (2 * tb * cin * mp      # xr + xi blocks
               + 2 * cin * tc * mp    # wr + wi blocks
               + 2 * tb * tc * mp) * 4  # out_r + out_i blocks
    footprint = 2 * per_buf           # double buffering
    return int(min(64 * 1024 * 1024, max(4 * 1024 * 1024, 2 * footprint)))


def _spectral_mix_kernel(xr_ref, xi_ref, wr_ref, wi_ref, or_ref, oi_ref):
    """out[b,o,m] = sum_i x[b,i,m] * w[i,o,m]  (complex), live modes only.

    Block shapes:
      xr_ref, xi_ref : (TB, Cin, Mp)   Mp = modes rounded up to 128
      wr_ref, wi_ref : (Cin, TC, Mp)
      or_ref, oi_ref : (TB, TC, Mp)
    """
    tb, cin, mp = xr_ref.shape
    tc = wr_ref.shape[1]

    def accumulate(xr_c, xi_c, wr_c, wi_c, acc_r, acc_i, n):
        # xr_c/xi_c: (TB, n, Mp); wr_c/wi_c: (n, TC, Mp); n is static.
        for j in range(n):
            xr_j = xr_c[:, j:j + 1, :]          # (TB, 1, Mp)
            xi_j = xi_c[:, j:j + 1, :]
            wr_j = wr_c[j:j + 1, :, :]          # (1, TC, Mp)
            wi_j = wi_c[j:j + 1, :, :]
            acc_r = acc_r + (xr_j * wr_j - xi_j * wi_j)
            acc_i = acc_i + (xr_j * wi_j + xi_j * wr_j)
        return acc_r, acc_i

    acc_r = jnp.zeros((tb, tc, mp), jnp.float32)
    acc_i = jnp.zeros((tb, tc, mp), jnp.float32)

    if cin <= _STATIC_CIN_MAX:
        acc_r, acc_i = accumulate(xr_ref[...], xi_ref[...],
                                  wr_ref[...], wi_ref[...],
                                  acc_r, acc_i, cin)
    else:
        # Wrapper pads Cin to a multiple of _CIN_CHUNK, so every dynamic slice
        # below starts on a sublane boundary with a full-granule size.
        n_chunks = cin // _CIN_CHUNK

        def body(c, carry):
            acc_r, acc_i = carry
            base = pl.multiple_of(c * _CIN_CHUNK, _CIN_CHUNK)
            xr_c = xr_ref[:, pl.ds(base, _CIN_CHUNK), :]
            xi_c = xi_ref[:, pl.ds(base, _CIN_CHUNK), :]
            wr_c = wr_ref[pl.ds(base, _CIN_CHUNK), :, :]
            wi_c = wi_ref[pl.ds(base, _CIN_CHUNK), :, :]
            return accumulate(xr_c, xi_c, wr_c, wi_c, acc_r, acc_i, _CIN_CHUNK)

        acc_r, acc_i = lax.fori_loop(0, n_chunks, body, (acc_r, acc_i))

    # Lane-dense stores (Mp is a multiple of 128); no zero tail is written.
    or_ref[...] = acc_r
    oi_ref[...] = acc_i


def compl_mul1d_pallas(xr, xi, w_real, w_imag):
    """Complex 'bix,iox->box' on the first M modes.

    Returns (out_r, out_i) of shape (B, Cout, M), float32."""
    B, Cin, M = xr.shape
    Cout = w_real.shape[1]

    Mp = _round_up(M, 128)                  # lane-dense mode axis
    pad_m = Mp - M
    if pad_m:
        pm = ((0, 0), (0, 0), (0, pad_m))
        xr, xi = jnp.pad(xr, pm), jnp.pad(xi, pm)
        w_real, w_imag = jnp.pad(w_real, pm), jnp.pad(w_imag, pm)

    # Pad Cin to a chunk multiple when the fori_loop path will be taken.
    Cin_p = Cin
    if Cin > _STATIC_CIN_MAX:
        Cin_p = _round_up(Cin, _CIN_CHUNK)
        if Cin_p != Cin:
            d = Cin_p - Cin
            xr = jnp.pad(xr, ((0, 0), (0, d), (0, 0)))
            xi = jnp.pad(xi, ((0, 0), (0, d), (0, 0)))
            w_real = jnp.pad(w_real, ((0, d), (0, 0), (0, 0)))
            w_imag = jnp.pad(w_imag, ((0, d), (0, 0), (0, 0)))

    TB = _pick_batch_block(B)
    Bp = _round_up(B, TB)
    if Bp != B:
        xr = jnp.pad(xr, ((0, Bp - B), (0, 0), (0, 0)))
        xi = jnp.pad(xi, ((0, Bp - B), (0, 0), (0, 0)))

    TC = _pick_cout_block(Cout, TB, Mp)
    n_co = Cout // TC

    # v7x has 2 TensorCores; keep the parallel grid at least 2 long if we can.
    if n_co * (Bp // TB) < 2 and Bp >= 2:
        TB = Bp // 2
        while Bp % TB:
            TB -= 1
    n_b = Bp // TB

    x_spec = pl.BlockSpec((TB, Cin_p, Mp), lambda co, b: (b, 0, 0))
    w_spec = pl.BlockSpec((Cin_p, TC, Mp), lambda co, b: (0, co, 0))
    o_spec = pl.BlockSpec((TB, TC, Mp), lambda co, b: (b, co, 0))

    out_shape = (
        jax.ShapeDtypeStruct((Bp, Cout, Mp), jnp.float32),
        jax.ShapeDtypeStruct((Bp, Cout, Mp), jnp.float32),
    )

    grid_spec = pltpu.PrefetchScalarGridSpec(
        num_scalar_prefetch=0,
        grid=(n_co, n_b),                    # batch innermost: weight block
        in_specs=[x_spec, x_spec, w_spec, w_spec],   # stays resident per co
        out_specs=[o_spec, o_spec],
    )

    out_r, out_i = pl.pallas_call(
        _spectral_mix_kernel,
        out_shape=out_shape,
        grid_spec=grid_spec,
        compiler_params=pltpu.CompilerParams(
            dimension_semantics=("parallel", "parallel"),
            vmem_limit_bytes=_vmem_limit_bytes(TB, TC, Cin_p, Mp),
        ),
    )(xr, xi, w_real, w_imag)

    return out_r[:B, :, :M], out_i[:B, :, :M]


class SpectralConv1d:
    """JAX/Pallas port of the PyTorch SpectralConv1d module."""

    def __init__(self, in_channels, out_channels, modes, key):
        self.in_channels = in_channels
        self.out_channels = out_channels
        self.modes = modes
        self.scale = 1.0 / (in_channels * out_channels)
        kr, ki = jax.random.split(key)
        # torch.rand(..., dtype=torch.cfloat): real & imag ~ U[0, 1)
        self.w_real = self.scale * jax.random.uniform(
            kr, (in_channels, out_channels, modes), dtype=jnp.float32)
        self.w_imag = self.scale * jax.random.uniform(
            ki, (in_channels, out_channels, modes), dtype=jnp.float32)

    def __call__(self, x):
        # x: [B, Cin, N] float32
        B, Cin, N = x.shape
        n_freq = N // 2 + 1
        M = self.modes
        assert M <= n_freq, "modes must be <= N//2 + 1"

        # --- glue: forward FFT (no Pallas equivalent) ---
        x_ft = jnp.fft.rfft(x, axis=-1)                   # [B, Cin, n_freq] c64
        xr = jnp.real(x_ft[:, :, :M]).astype(jnp.float32)
        xi = jnp.imag(x_ft[:, :, :M]).astype(jnp.float32)

        # --- hot path: complex mode mixing in Pallas (live modes only) ---
        out_r, out_i = compl_mul1d_pallas(xr, xi, self.w_real, self.w_imag)

        # --- glue: inverse FFT.  irfft(n=N) zero-pads the short spectrum
        #     (modes >= M) to N//2+1 internally, matching the reference's
        #     explicit zero-filled out_ft. ---
        out_ft_m = jax.lax.complex(out_r, out_i)          # [B, Cout, M]
        return jnp.fft.irfft(out_ft_m, n=N, axis=-1)      # [B, Cout, N] f32


def _reference_forward(x, w_real, w_imag, modes):
    """Pure-JAX reference mirroring the PyTorch forward exactly."""
    B, Cin, N = x.shape
    n_freq = N // 2 + 1
    x_ft = jnp.fft.rfft(x, axis=-1)[:, :, :modes]
    w = w_real + 1j * w_imag
    out_m = jnp.einsum('bix,iox->box', x_ft, w,
                       precision=jax.lax.Precision.HIGHEST)
    out_ft = jnp.zeros((B, w.shape[1], n_freq), dtype=jnp.complex64)
    out_ft = out_ft.at[:, :, :modes].set(out_m)
    return jnp.fft.irfft(out_ft, n=N, axis=-1)


def _run_case(B, Cin, Cout, N, modes, key):
    k_x, k_w = jax.random.split(key)
    x = jax.random.normal(k_x, (B, Cin, N), dtype=jnp.float32)
    layer = SpectralConv1d(Cin, Cout, modes, k_w)

    out = jax.jit(layer.__call__)(x)
    out = jax.block_until_ready(out)

    ref = _reference_forward(x, layer.w_real, layer.w_imag, modes)
    ref = jax.block_until_ready(ref)

    assert out.shape == (B, Cout, N)
    np.testing.assert_allclose(np.asarray(out), np.asarray(ref),
                               rtol=1e-4, atol=1e-5)


if __name__ == "__main__":
    key = jax.random.PRNGKey(0)
    k1, k2 = jax.random.split(key)

    # Small toy shapes matching the module's expected inputs.
    _run_case(B=2, Cin=4, Cout=4, N=16, modes=8, key=k1)

    # Larger case: exercises Cout tiling, the chunked fori_loop Cin path,
    # Cin/batch handling, odd batch, and irfft zero-padding of unused modes.
    _run_case(B=3, Cin=20, Cout=16, N=64, modes=20, key=k2)

    print("KERNEL_OK")
</pallas_src>

<mosaic_0001>
module attributes {stable_mosaic.version = 11 : i64} {
  func.func @_spectral_mix_kernel(%arg0: i32, %arg1: i32, %arg2: memref<1x4x128xf32, #tpu.memory_space<vmem>>, %arg3: memref<1x4x128xf32, #tpu.memory_space<vmem>>, %arg4: memref<4x4x128xf32, #tpu.memory_space<vmem>>, %arg5: memref<4x4x128xf32, #tpu.memory_space<vmem>>, %arg6: memref<1x4x128xf32, #tpu.memory_space<vmem>>, %arg7: memref<1x4x128xf32, #tpu.memory_space<vmem>>) attributes {dimension_semantics = [#tpu.dimension_semantics<parallel>, #tpu.dimension_semantics<parallel>], iteration_bounds = array<i64: 1, 2>, scalar_prefetch = 0 : i64, scratch_operands = 0 : i64, tpu.core_type = #tpu.core_type<tc>, window_params = [{transform_indices = @transform_0, window_bounds = array<i64: 1, 4, 128>}, {transform_indices = @transform_1, window_bounds = array<i64: 1, 4, 128>}, {transform_indices = @transform_2, window_bounds = array<i64: 4, 4, 128>}, {transform_indices = @transform_3, window_bounds = array<i64: 4, 4, 128>}, {transform_indices = @transform_4, window_bounds = array<i64: 1, 4, 128>}, {transform_indices = @transform_5, window_bounds = array<i64: 1, 4, 128>}]} {
    %cst = arith.constant 0.000000e+00 : f32
    %0 = vector.broadcast %cst : f32 to vector<1x4x128xf32>
    %cst_0 = arith.constant 0.000000e+00 : f32
    %1 = vector.broadcast %cst_0 : f32 to vector<1x4x128xf32>
    %c0 = arith.constant 0 : index
    %c0_1 = arith.constant 0 : index
    %c0_2 = arith.constant 0 : index
    %2 = vector.load %arg2[%c0, %c0_1, %c0_2] : memref<1x4x128xf32, #tpu.memory_space<vmem>>, vector<1x4x128xf32>
    %c0_3 = arith.constant 0 : index
    %c0_4 = arith.constant 0 : index
    %c0_5 = arith.constant 0 : index
    %3 = vector.load %arg3[%c0_3, %c0_4, %c0_5] : memref<1x4x128xf32, #tpu.memory_space<vmem>>, vector<1x4x128xf32>
    %c0_6 = arith.constant 0 : index
    %c0_7 = arith.constant 0 : index
    %c0_8 = arith.constant 0 : index
    %4 = vector.load %arg4[%c0_6, %c0_7, %c0_8] : memref<4x4x128xf32, #tpu.memory_space<vmem>>, vector<4x4x128xf32>
    %c0_9 = arith.constant 0 : index
    %c0_10 = arith.constant 0 : index
    %c0_11 = arith.constant 0 : index
    %5 = vector.load %arg5[%c0_9, %c0_10, %c0_11] : memref<4x4x128xf32, #tpu.memory_space<vmem>>, vector<4x4x128xf32>
    %6 = vector.extract_strided_slice %2 {offsets = [0, 0, 0], sizes = [1, 1, 128], strides = [1, 1, 1]} : vector<1x4x128xf32> to vector<1x1x128xf32>
    %7 = vector.extract_strided_slice %3 {offsets = [0, 0, 0], sizes = [1, 1, 128], strides = [1, 1, 1]} : vector<1x4x128xf32> to vector<1x1x128xf32>
    %8 = vector.extract_strided_slice %4 {offsets = [0, 0, 0], sizes = [1, 4, 128], strides = [1, 1, 1]} : vector<4x4x128xf32> to vector<1x4x128xf32>
    %9 = vector.extract_strided_slice %5 {offsets = [0, 0, 0], sizes = [1, 4, 128], strides = [1, 1, 1]} : vector<4x4x128xf32> to vector<1x4x128xf32>
    %10 = vector.broadcast %6 : vector<1x1x128xf32> to vector<1x4x128xf32>
    %11 = arith.mulf %10, %8 : vector<1x4x128xf32>
    %12 = vector.broadcast %7 : vector<1x1x128xf32> to vector<1x4x128xf32>
    %13 = arith.mulf %12, %9 : vector<1x4x128xf32>
    %14 = arith.subf %11, %13 : vector<1x4x128xf32>
    %15 = arith.addf %0, %14 : vector<1x4x128xf32>
    %16 = vector.broadcast %6 : vector<1x1x128xf32> to vector<1x4x128xf32>
    %17 = arith.mulf %16, %9 : vector<1x4x128xf32>
    %18 = vector.broadcast %7 : vector<1x1x128xf32> to vector<1x4x128xf32>
    %19 = arith.mulf %18, %8 : vector<1x4x128xf32>
    %20 = arith.addf %17, %19 : vector<1x4x128xf32>
    %21 = arith.addf %1, %20 : vector<1x4x128xf32>
    %22 = vector.extract_strided_slice %2 {offsets = [0, 1, 0], sizes = [1, 1, 128], strides = [1, 1, 1]} : vector<1x4x128xf32> to vector<1x1x128xf32>
    %23 = vector.extract_strided_slice %3 {offsets = [0, 1, 0], sizes = [1, 1, 128], strides = [1, 1, 1]} : vector<1x4x128xf32> to vector<1x1x128xf32>
    %24 = vector.extract_strided_slice %4 {offsets = [1, 0, 0], sizes = [1, 4, 128], strides = [1, 1, 1]} : vector<4x4x128xf32> to vector<1x4x128xf32>
    %25 = vector.extract_strided_slice %5 {offsets = [1, 0, 0], sizes = [1, 4, 128], strides = [1, 1, 1]} : vector<4x4x128xf32> to vector<1x4x128xf32>
    %26 = vector.broadcast %22 : vector<1x1x128xf32> to vector<1x4x128xf32>
    %27 = arith.mulf %26, %24 : vector<1x4x128xf32>
    %28 = vector.broadcast %23 : vector<1x1x128xf32> to vector<1x4x128xf32>
    %29 = arith.mulf %28, %25 : vector<1x4x128xf32>
    %30 = arith.subf %27, %29 : vector<1x4x128xf32>
    %31 = arith.addf %15, %30 : vector<1x4x128xf32>
    %32 = vector.broadcast %22 : vector<1x1x128xf32> to vector<1x4x128xf32>
    %33 = arith.mulf %32, %25 : vector<1x4x128xf32>
    %34 = vector.broadcast %23 : vector<1x1x128xf32> to vector<1x4x128xf32>
    %35 = arith.mulf %34, %24 : vector<1x4x128xf32>
    %36 = arith.addf %33, %35 : vector<1x4x128xf32>
    %37 = arith.addf %21, %36 : vector<1x4x128xf32>
    %38 = vector.extract_strided_slice %2 {offsets = [0, 2, 0], sizes = [1, 1, 128], strides = [1, 1, 1]} : vector<1x4x128xf32> to vector<1x1x128xf32>
    %39 = vector.extract_strided_slice %3 {offsets = [0, 2, 0], sizes = [1, 1, 128], strides = [1, 1, 1]} : vector<1x4x128xf32> to vector<1x1x128xf32>
    %40 = vector.extract_strided_slice %4 {offsets = [2, 0, 0], sizes = [1, 4, 128], strides = [1, 1, 1]} : vector<4x4x128xf32> to vector<1x4x128xf32>
    %41 = vector.extract_strided_slice %5 {offsets = [2, 0, 0], sizes = [1, 4, 128], strides = [1, 1, 1]} : vector<4x4x128xf32> to vector<1x4x128xf32>
    %42 = vector.broadcast %38 : vector<1x1x128xf32> to vector<1x4x128xf32>
    %43 = arith.mulf %42, %40 : vector<1x4x128xf32>
    %44 = vector.broadcast %39 : vector<1x1x128xf32> to vector<1x4x128xf32>
    %45 = arith.mulf %44, %41 : vector<1x4x128xf32>
    %46 = arith.subf %43, %45 : vector<1x4x128xf32>
    %47 = arith.addf %31, %46 : vector<1x4x128xf32>
    %48 = vector.broadcast %38 : vector<1x1x128xf32> to vector<1x4x128xf32>
    %49 = arith.mulf %48, %41 : vector<1x4x128xf32>
    %50 = vector.broadcast %39 : vector<1x1x128xf32> to vector<1x4x128xf32>
    %51 = arith.mulf %50, %40 : vector<1x4x128xf32>
    %52 = arith.addf %49, %51 : vector<1x4x128xf32>
    %53 = arith.addf %37, %52 : vector<1x4x128xf32>
    %54 = vector.extract_strided_slice %2 {offsets = [0, 3, 0], sizes = [1, 1, 128], strides = [1, 1, 1]} : vector<1x4x128xf32> to vector<1x1x128xf32>
    %55 = vector.extract_strided_slice %3 {offsets = [0, 3, 0], sizes = [1, 1, 128], strides = [1, 1, 1]} : vector<1x4x128xf32> to vector<1x1x128xf32>
    %56 = vector.extract_strided_slice %4 {offsets = [3, 0, 0], sizes = [1, 4, 128], strides = [1, 1, 1]} : vector<4x4x128xf32> to vector<1x4x128xf32>
    %57 = vector.extract_strided_slice %5 {offsets = [3, 0, 0], sizes = [1, 4, 128], strides = [1, 1, 1]} : vector<4x4x128xf32> to vector<1x4x128xf32>
    %58 = vector.broadcast %54 : vector<1x1x128xf32> to vector<1x4x128xf32>
    %59 = arith.mulf %58, %56 : vector<1x4x128xf32>
    %60 = vector.broadcast %55 : vector<1x1x128xf32> to vector<1x4x128xf32>
    %61 = arith.mulf %60, %57 : vector<1x4x128xf32>
    %62 = arith.subf %59, %61 : vector<1x4x128xf32>
    %63 = arith.addf %47, %62 : vector<1x4x128xf32>
    %64 = vector.broadcast %54 : vector<1x1x128xf32> to vector<1x4x128xf32>
    %65 = arith.mulf %64, %57 : vector<1x4x128xf32>
    %66 = vector.broadcast %55 : vector<1x1x128xf32> to vector<1x4x128xf32>
    %67 = arith.mulf %66, %56 : vector<1x4x128xf32>
    %68 = arith.addf %65, %67 : vector<1x4x128xf32>
    %69 = arith.addf %53, %68 : vector<1x4x128xf32>
    %c0_12 = arith.constant 0 : index
    %c0_13 = arith.constant 0 : index
    %c0_14 = arith.constant 0 : index
    %70 = vector.load %arg6[%c0_12, %c0_13, %c0_14] : memref<1x4x128xf32, #tpu.memory_space<vmem>>, vector<1x4x128xf32>
    tpu.vector_store %arg6[%c0_12, %c0_13, %c0_14], %63 {strides = array<i32>} : memref<1x4x128xf32, #tpu.memory_space<vmem>>, vector<1x4x128xf32>,
    %c0_15 = arith.constant 0 : index
    %c0_16 = arith.constant 0 : index
    %c0_17 = arith.constant 0 : index
    %71 = vector.load %arg7[%c0_15, %c0_16, %c0_17] : memref<1x4x128xf32, #tpu.memory_space<vmem>>, vector<1x4x128xf32>
    tpu.vector_store %arg7[%c0_15, %c0_16, %c0_17], %69 {strides = array<i32>} : memref<1x4x128xf32, #tpu.memory_space<vmem>>, vector<1x4x128xf32>,
    return
  }
  func.func @transform_0(%arg0: i32, %arg1: i32) -> (i32, i32, i32) {
    %c0_i32 = arith.constant 0 : i32
    %c0_i32_0 = arith.constant 0 : i32
    %c0_i32_1 = arith.constant 0 : i32
    return %arg1, %c0_i32, %c0_i32_0 : i32, i32, i32
  }
  func.func @transform_1(%arg0: i32, %arg1: i32) -> (i32, i32, i32) {
    %c0_i32 = arith.constant 0 : i32
    %c0_i32_0 = arith.constant 0 : i32
    %c0_i32_1 = arith.constant 0 : i32
    return %arg1, %c0_i32, %c0_i32_0 : i32, i32, i32
  }
  func.func @transform_2(%arg0: i32, %arg1: i32) -> (i32, i32, i32) {
    %c0_i32 = arith.constant 0 : i32
    %c0_i32_0 = arith.constant 0 : i32
    %c0_i32_1 = arith.constant 0 : i32
    return %c0_i32, %arg0, %c0_i32_0 : i32, i32, i32
  }
  func.func @transform_3(%arg0: i32, %arg1: i32) -> (i32, i32, i32) {
    %c0_i32 = arith.constant 0 : i32
    %c0_i32_0 = arith.constant 0 : i32
    %c0_i32_1 = arith.constant 0 : i32
    return %c0_i32, %arg0, %c0_i32_0 : i32, i32, i32
  }
  func.func @transform_4(%arg0: i32, %arg1: i32) -> (i32, i32, i32) {
    %c0_i32 = arith.constant 0 : i32
    %c0_i32_0 = arith.constant 0 : i32
    return %arg1, %arg0, %c0_i32 : i32, i32, i32
  }
  func.func @transform_5(%arg0: i32, %arg1: i32) -> (i32, i32, i32) {
    %c0_i32 = arith.constant 0 : i32
    %c0_i32_0 = arith.constant 0 : i32
    return %arg1, %arg0, %c0_i32 : i32, i32, i32
  }
}

</mosaic_0001>

<bundles_post_ra>
// kernel: reverse.1
= control target key start
LH: loop header
LB: loop body
LE: loop exit
PB: predicated region body
PF: predicated region fallthrough
CT: control target
= control target key end

     0   :  { %v2_v0 = vlaneseq  ;;  %s152_s0 = inlined_call_operand.vmem [shape: f32[2,4,7], index: 0, kind: input, shape index: {}]   ;;  %s153_s1 = inlined_call_operand.vmem [shape: f32[2,4,7], index: 1, kind: output, shape index: {}]  }
   0x2   :  { %v3_v1 = vsub.s32 6, %v2_v0 }
   0x4   :  { %4 = vset.pattern.permute.xlu0 %v3_v1 }
   0x5   :  { %v21_v2 = vld [vmem:[%s152_s0] sm:$0xff]  }
   0x6   :  { %22 = vst [vmem:[#allocation1] sm:$0xff] %v21_v2  }
   0xd   :  { %v56_v3 = vld [vmem:[#allocation1] sm:$0xf]  ;;  %v53_v4 = vld [vmem:[#allocation1 + $0x4] sm:$0xf] }
   0xe   :  { %57 = vst [vmem:[#allocation0] sm:$0xf] %v56_v3 }
   0xf   :  { %55 = vst [vmem:[#allocation0 + $0x8] sm:$0xf] %v53_v4 }
  0x15   :  { %v58_v5 = vld [vmem:[#allocation0] sm:$0xff] }
  0x16   :  { %59 = vperm.xlu0 %4, %v58_v5   ;;  %v64_v6 = vld [vmem:[#allocation0 + $0x8] sm:$0xff] }
  0x1e   :  { %65 = vperm.xlu0 %4, %v64_v6  }
  0x88   :  { %v60_v7 = vpop.permute.xlu0 %59 }
  0x89   :  { %61 = vst [vmem:[#allocation2 + $0x8] sm:$0xff] %v60_v7 }
  0x90   :  { %v70_v8 = vld [vmem:[#allocation2 + $0x8] sm:$0xf]  ;;  %v66_v9 = vpop.permute.xlu0 %65 }
  0x91   :  { %73 = vst [vmem:[#allocation3] sm:$0xf] %v70_v8 }
  0x92   :  { %67 = vst [vmem:[#allocation2] sm:$0xff] %v66_v9 }
  0x98   :  { %v96_v10 = vld [vmem:[#allocation3] sm:$0xf] }
  0x99   :  { %97 = vst [vmem:[%s153_s1] sm:$0xf] %v96_v10  ;;  %v75_v11 = vld [vmem:[#allocation2] sm:$0xf] }
  0x9a   :  { %79 = vst [vmem:[#allocation3 + $0x4] sm:$0xf] %v75_v11 }
  0xa1   :  { %v98_v12 = vld [vmem:[#allocation3 + $0x4] sm:$0xf] }
  0xa2   :  { %99 = vst [vmem:[%s153_s1 + $0x4] sm:$0xf] %v98_v12 }

// kernel: a_call__.1
= control target key start
LH: loop header
LB: loop body
LE: loop exit
PB: predicated region body
PF: predicated region fallthrough
CT: control target
= control target key end

     0   :  { %s608_s18 = smov 0   ;;  %s610_s19 = smov 0   ;;  %s677_s0 = inlined_call_operand.vmem [shape: f32[2,4,128], index: 0, kind: input, shape index: {}]   ;;  %s678_s1 = inlined_call_operand.vmem [shape: f32[2,4,128], index: 1, kind: input, shape index: {}]   ;;  %s679_s2 = inlined_call_operand.vmem [shape: f32[4,4,128], index: 2, kind: input, shape index: {}]   ;;  %s680_s3 = inlined_call_operand.vmem [shape: f32[4,4,128], index: 3, kind: input, shape index: {}]   ;;  %s681_s4 = inlined_call_operand.vmem [shape: f32[2,4,128], index: 4, kind: output, shape index: {0}]   ;;  %s682_s5 = inlined_call_operand.vmem [shape: f32[2,4,128], index: 5, kind: output, shape index: {1}]  }
   0x1   :  { %s612_s20 = smov 0  }
   0x2 LB: > { %s25_s21 = sadd.s32 1, %s572_s19  ;;  %p523_p0 = scmp.ge.s32.totalorder %s576_s20, 1  ;;  %s576_s20 = sphi %s612_s20, %s16_s20   ;;  %s572_s19 = sphi %s610_s19, %s684_s19   ;;  %s568_s18 = sphi %s608_s18, %s683_s18  }
   0x3   : > { %p26_p1 = scmp.ge.s32.totalorder %s25_s21, 2  ;;  %p232_p2 = scmp.lt.s32.totalorder %s576_s20, 3 }
   0x5   : > { %s686_s21 = smov (%p26_p1, %s25_s21), 0  ;;  %p233_p3 = pnand %p523_p0, %p232_p2 }
   0x6   : > { %p280_p4 = scmp.lt.s32.totalorder (!%p233_p3), %s568_s18, 1 }
   0x7   : > { %236 = sbr.rel (%p233_p3) target bundleno = 31 (0x1f), region = 36 }
   0xc   : > { %s688_s18 = smov (!%p280_p4, %s568_s18), 1  ;;  %v312_v0 = vld [vmem:[%s679_s2] sm:$0xf]  ;;  %v313_v1 = vld [vmem:[%s679_s2 + $0x4] sm:$0xf] }
   0xd   : > { %s626_s22 = sshll.u32 %s688_s18, 2  ;;  %v314_v2 = vld [vmem:[%s679_s2 + $0x8] sm:$0xf]  ;;  %v315_v3 = vld [vmem:[%s679_s2 + $0xc] sm:$0xf] }
   0xe   : > { %s283_s29 = scalar_lea.vmem %s677_s0, %s626_s22  ;;  %s287_s7 = scalar_lea.vmem %s678_s1, %s626_s22  ;;  %v316_v4 = vld [vmem:[%s680_s3] sm:$0xf]  ;;  %v317_v5 = vld [vmem:[%s680_s3 + $0x4] sm:$0xf]  ;;  %v318_v8 = vld [vmem:[%s680_s3 + $0x8] sm:$0xf] }
   0xf   : > { %v310_v6 = vld [vmem:[%s283_s29] sm:$0xf]  ;;  %v319_v9 = vld [vmem:[%s680_s3 + $0xc] sm:$0xf]  ;;  %s302_s26 = scalar_lea.vmem %s681_s4, %s626_s22  ;;  %s309_s29 = scalar_lea.vmem %s682_s5, %s626_s22 }
  0x10   : > { %v311_v7 = vld [vmem:[%s287_s7] sm:$0xf]  ;;  %v320_v10 = vperm.slane %v310_v6, 0  ;;  %v330_v12 = vperm.slane %v310_v6, 1  ;;  %v340_v14 = vperm.slane %v310_v6, 2  ;;  %v350_v16 = vperm.slane %v310_v6, 3 }
  0x11   : > { %v322_v11 = vperm.slane %v311_v7, 0  ;;  %v332_v13 = vperm.slane %v311_v7, 1  ;;  %v342_v15 = vperm.slane %v311_v7, 2  ;;  %v352_v17 = vperm.slane %v311_v7, 3 }
  0x12   : > { %v321_v18 = vmul.f32 %v320_v10, %v312_v0  ;;  %v331_v20 = vmul.f32 %v330_v12, %v313_v1  ;;  %v341_v22 = vmul.f32 %v340_v14, %v314_v2  ;;  %v351_v24 = vmul.f32 %v350_v16, %v315_v3 }
  0x13   : > { %v323_v19 = vmul.f32 %v322_v11, %v316_v4  ;;  %v333_v21 = vmul.f32 %v332_v13, %v317_v5  ;;  %v343_v23 = vmul.f32 %v342_v15, %v318_v8  ;;  %v353_v25 = vmul.f32 %v352_v17, %v319_v9 }
  0x14   : > { %v326_v28 = vmul.f32 %v320_v10, %v316_v4  ;;  %v327_v29 = vmul.f32 %v322_v11, %v312_v0  ;;  %v336_v32 = vmul.f32 %v330_v12, %v317_v5  ;;  %v337_v33 = vmul.f32 %v332_v13, %v313_v1 }
  0x15   : > { %v324_v26 = vsub.f32 %v321_v18, %v323_v19  ;;  %v334_v27 = vsub.f32 %v331_v20, %v333_v21  ;;  %v344_v30 = vsub.f32 %v341_v22, %v343_v23  ;;  %v354_v31 = vsub.f32 %v351_v24, %v353_v25 }
  0x16   : > { %v328_v35 = vadd.f32 %v327_v29, %v326_v28  ;;  %v346_v36 = vmul.f32 %v340_v14, %v318_v8  ;;  %v347_v37 = vmul.f32 %v342_v15, %v314_v2  ;;  %v338_v38 = vadd.f32 %v337_v33, %v336_v32 }
  0x17   : > { %v335_v34 = vadd.f32 %v334_v27, %v324_v26  ;;  %v356_v39 = vmul.f32 %v350_v16, %v319_v9  ;;  %v357_v40 = vmul.f32 %v352_v17, %v315_v3 }
  0x18   : > { %v348_v42 = vadd.f32 %v347_v37, %v346_v36  ;;  %v339_v43 = vadd.f32 %v338_v38, %v328_v35 }
  0x19   : > { %v345_v41 = vadd.f32 %v344_v30, %v335_v34  ;;  %v358_v44 = vadd.f32 %v357_v40, %v356_v39 }
  0x1a   : > { %v349_v46 = vadd.f32 %v348_v42, %v339_v43 }
  0x1b   : > { %v355_v45 = vadd.f32 %v354_v31, %v345_v41 }
  0x1c   : > { %v359_v47 = vadd.f32 %v358_v44, %v349_v46 }
  0x1d   : > { %360 = vst [vmem:[%s302_s26] sm:$0xf] %v355_v45 }
  0x1e   : > { %361 = vst [vmem:[%s309_s29] sm:$0xf] %v359_v47 }
  0x1f PF: > { %s16_s20 = sadd.s32 1, %s576_s20   ;;  %s683_s18 = smov %s572_s19 }
  0x20   : > { %p13_p5 = scmp.ge.s32.totalorder %s16_s20, 4   ;;  %s684_s19 = smov %s686_s21 }
  0x22   :  { %15 = sbr.rel (!%p13_p5) target bundleno = 2 (0x2), region = 87 }

</bundles_post_ra>
